<compile_context>
chip_gen: v7x
topology: tpu7x:2x2x1
jax: 0.10.0
libtpu: 0.0.40
codegen_flags: <defaults>
</compile_context>

<pallas_src>
from functools import partial

import jax
import jax.numpy as jnp
from jax.experimental import pallas as pl
from jax.experimental.pallas import tpu as pltpu


def pooler_kernel(hidden_ref, w_ref, b_ref, out_ref):
    """tanh(hidden[:, 0, :] @ W + b), computed entirely in VMEM / vregs."""
    x = hidden_ref[...]                       # (B, S, H) f32, whole-array block
    cls = x[:, 0, :]                          # (B, H) CLS-token rows
    y = jnp.dot(cls, w_ref[...], preferred_element_type=jnp.float32) + b_ref[...]
    out_ref[...] = jnp.tanh(y)                # single unconditional store


def custom_bert_pooler(hidden_state, w, b):
    """Pallas wrapper.  hidden_state: (B, S, H) f32, w: (H, H) stored (in, out), b: (1, H)."""
    B, S, H = hidden_state.shape
    return pl.pallas_call(
        pooler_kernel,
        out_shape=jax.ShapeDtypeStruct((B, H), jnp.float32),
        grid=(1,),                                              # single grid step
        in_specs=[
            pl.BlockSpec((B, S, H), lambda i: (0, 0, 0)),       # whole activation block
            pl.BlockSpec((H, H), lambda i: (0, 0)),             # dense weight
            pl.BlockSpec((1, H), lambda i: (0, 0)),             # dense bias (sublane bcast)
        ],
        out_specs=pl.BlockSpec((B, H), lambda i: (0, 0)),
        compiler_params=pltpu.CompilerParams(
            dimension_semantics=("arbitrary",)),
    )(hidden_state, w, b)


if __name__ == "__main__":
    cfg = dict(hidden_size=32)
    B, S, H = 2, 8, cfg["hidden_size"]

    key = jax.random.PRNGKey(0)
    k_h, k_w, k_b = jax.random.split(key, 3)
    hidden_state = jax.random.normal(k_h, (B, S, H), dtype=jnp.float32)
    # nn.Linear weight stored as (in_features, out_features): y = x @ W + b
    # (identical semantics to PyTorch's x @ W_torch.T + b).
    w = 0.02 * jax.random.normal(k_w, (H, H), dtype=jnp.float32)
    b = 0.02 * jax.random.normal(k_b, (1, H), dtype=jnp.float32)

    pooled = jax.jit(custom_bert_pooler)(hidden_state, w, b)
    jax.block_until_ready(pooled)

    # pure-JAX reference, tolerance-asserted before trusting the kernel
    ref = jnp.tanh(hidden_state[:, 0, :] @ w + b)
    assert pooled.shape == (B, H)
    assert bool(jnp.allclose(pooled, ref, atol=1e-4, rtol=1e-4)), "kernel/reference mismatch"
    print("KERNEL_OK")
</pallas_src>

<mosaic_0001>
module attributes {stable_mosaic.version = 11 : i64} {
  func.func @pooler_kernel(%arg0: i32, %arg1: memref<2x8x32xf32, #tpu.memory_space<vmem>>, %arg2: memref<32x32xf32, #tpu.memory_space<vmem>>, %arg3: memref<1x32xf32, #tpu.memory_space<vmem>>, %arg4: memref<2x32xf32, #tpu.memory_space<vmem>>) attributes {dimension_semantics = [#tpu.dimension_semantics<arbitrary>], iteration_bounds = array<i64: 1>, scalar_prefetch = 0 : i64, scratch_operands = 0 : i64, tpu.core_type = #tpu.core_type<tc>, window_params = [{pipeline_mode = #tpu.pipeline_mode<synchronous>, transform_indices = @transform_0, window_bounds = array<i64: 2, 8, 32>}, {pipeline_mode = #tpu.pipeline_mode<synchronous>, transform_indices = @transform_1, window_bounds = array<i64: 32, 32>}, {pipeline_mode = #tpu.pipeline_mode<synchronous>, transform_indices = @transform_2, window_bounds = array<i64: 1, 32>}, {pipeline_mode = #tpu.pipeline_mode<synchronous>, transform_indices = @transform_3, window_bounds = array<i64: 2, 32>}]} {
    %c0 = arith.constant 0 : index
    %c0_0 = arith.constant 0 : index
    %c0_1 = arith.constant 0 : index
    %0 = vector.load %arg1[%c0, %c0_0, %c0_1] : memref<2x8x32xf32, #tpu.memory_space<vmem>>, vector<2x8x32xf32>
    %1 = vector.extract_strided_slice %0 {offsets = [0, 0, 0], sizes = [2, 1, 32], strides = [1, 1, 1]} : vector<2x8x32xf32> to vector<2x1x32xf32>
    %2 = vector.shape_cast %1 : vector<2x1x32xf32> to vector<2x32xf32>
    %c0_2 = arith.constant 0 : index
    %c0_3 = arith.constant 0 : index
    %3 = vector.load %arg2[%c0_2, %c0_3] : memref<32x32xf32, #tpu.memory_space<vmem>>, vector<32x32xf32>
    %cst = arith.constant dense<0.000000e+00> : vector<2x32xf32>
    %4 = tpu.matmul %2, %3, %cst {dimension_numbers = #tpu.dot_dimension_numbers<[1], [0], [0], [1], [0, 0, 1, 1], [], []>} : vector<2x32xf32>, vector<32x32xf32>, vector<2x32xf32> -> vector<2x32xf32>
    %c0_4 = arith.constant 0 : index
    %c0_5 = arith.constant 0 : index
    %5 = vector.load %arg3[%c0_4, %c0_5] : memref<1x32xf32, #tpu.memory_space<vmem>>, vector<1x32xf32>
    %6 = vector.broadcast %5 : vector<1x32xf32> to vector<2x32xf32>
    %7 = arith.addf %4, %6 : vector<2x32xf32>
    %8 = math.tanh %7 : vector<2x32xf32>
    %c0_6 = arith.constant 0 : index
    %c0_7 = arith.constant 0 : index
    %9 = vector.load %arg4[%c0_6, %c0_7] : memref<2x32xf32, #tpu.memory_space<vmem>>, vector<2x32xf32>
    tpu.vector_store %arg4[%c0_6, %c0_7], %8 {strides = array<i32>} : memref<2x32xf32, #tpu.memory_space<vmem>>, vector<2x32xf32>,
    return
  }
  func.func @transform_0(%arg0: i32) -> (i32, i32, i32) {
    %c0_i32 = arith.constant 0 : i32
    %c0_i32_0 = arith.constant 0 : i32
    %c0_i32_1 = arith.constant 0 : i32
    %c0_i32_2 = arith.constant 0 : i32
    return %c0_i32, %c0_i32_0, %c0_i32_1 : i32, i32, i32
  }
  func.func @transform_1(%arg0: i32) -> (i32, i32) {
    %c0_i32 = arith.constant 0 : i32
    %c0_i32_0 = arith.constant 0 : i32
    %c0_i32_1 = arith.constant 0 : i32
    return %c0_i32, %c0_i32_0 : i32, i32
  }
  func.func @transform_2(%arg0: i32) -> (i32, i32) {
    %c0_i32 = arith.constant 0 : i32
    %c0_i32_0 = arith.constant 0 : i32
    %c0_i32_1 = arith.constant 0 : i32
    return %c0_i32, %c0_i32_0 : i32, i32
  }
  func.func @transform_3(%arg0: i32) -> (i32, i32) {
    %c0_i32 = arith.constant 0 : i32
    %c0_i32_0 = arith.constant 0 : i32
    %c0_i32_1 = arith.constant 0 : i32
    return %c0_i32, %c0_i32_0 : i32, i32
  }
}

</mosaic_0001>

<bundles_post_ra>
// kernel: custom_bert_pooler.1
= control target key start
LH: loop header
LB: loop body
LE: loop exit
PB: predicated region body
PF: predicated region fallthrough
CT: control target
= control target key end

     0   :  { %8 = vsyncpa [#allocation3], 0  ;;  %s326_s0 = inlined_call_operand.hbm [shape: f32[2,8,32], index: 0, kind: input, shape index: {}]   ;;  %s327_s1 = inlined_call_operand.hbm [shape: f32[32,32], index: 1, kind: input, shape index: {}]   ;;  %s328_s2 = inlined_call_operand.vmem [shape: f32[1,32], index: 2, kind: input, shape index: {}]   ;;  %s329_s3 = inlined_call_operand.hbm [shape: f32[2,32], index: 3, kind: output, shape index: {}]  }
   0x1   :  { %9 = vsyncpa [#allocation6], 0 }
   0x2   :  { %10 = vsyncpa [#allocation4], 0  ;;  %s259_s12 = smov [#allocation2]   ;;  %s187_s16 = scalar_lea.hbm %s326_s0, 256 }
   0x3   :  { %s16_s13 = sshll.u32 %s259_s12, 4  ;;  %p188_p0 = scmp.ne.s32.totalorder %s326_s0, %s187_s16  ;;  %s17_s13 = int_to_ptr.vmem [resolvable:$true] %s16_s13 }
   0x4   :  { %p191_p1 = scmp.lt.u32.totalorder %s187_s16, %s326_s0 }
   0x6   :  { %p193_p2 = pnand %p191_p1, %p188_p0 }
   0x8   :  { %196 = shalt.err (!%p193_p2)
}
   0x9   :  { %s197_s21 = scalar_lea.vmem %s17_s13, 256  ;;  %p202_p4 = scmp.lt.s32.totalorder %s17_s13, %s17_s13 }
   0xa   :  { %p198_p3 = scmp.ne.s32.totalorder %s17_s13, %s197_s21  ;;  %p203_p5 = scmp.lt.s32.totalorder %s197_s21, %s197_s21 }
   0xc   :  { %p204_p6 = por %p203_p5, %p202_p4 }
   0xe   :  { %p205_p7 = pnand %p204_p6, %p198_p3 }
  0x10   :  { %208 = shalt.err (!%p205_p7)
}
  0x11   :  { %s260_s22 = smov 128   ;;  %s261_s23 = smov 8  }
  0x12   :  { %22 = dma.hbm_to_vmem [thread:$0]  %s326_s0, 256, %s17_s13, [#allocation3], %s260_s22, %s260_s22, %s261_s23  }
  0x13   :  { %s262_s26 = smov [#allocation5]   ;;  %s209_s30 = scalar_lea.hbm %s327_s1, 512 }
  0x14   :  { %s28_s27 = sshll.u32 %s262_s26, 4  ;;  %p210_p8 = scmp.ne.s32.totalorder %s327_s1, %s209_s30  ;;  %s29_s27 = int_to_ptr.vmem [resolvable:$true] %s28_s27 }
  0x15   :  { %p213_p9 = scmp.lt.u32.totalorder %s209_s30, %s327_s1 }
  0x17   :  { %p215_p10 = pnand %p213_p9, %p210_p8 }
  0x19   :  { %218 = shalt.err (!%p215_p10)
}
  0x1a   :  { %s219_s8 = scalar_lea.vmem %s29_s27, 512  ;;  %p224_p12 = scmp.lt.s32.totalorder %s29_s27, %s29_s27 }
  0x1b   :  { %p220_p11 = scmp.ne.s32.totalorder %s29_s27, %s219_s8  ;;  %p225_p13 = scmp.lt.s32.totalorder %s219_s8, %s219_s8 }
  0x1d   :  { %p226_p0 = por %p225_p13, %p224_p12 }
  0x1f   :  { %p227_p1 = pnand %p226_p0, %p220_p11 }
  0x21   :  { %230 = shalt.err (!%p227_p1)
}
  0x22   :  { %34 = dma.hbm_to_vmem [thread:$0]  %s327_s1, 512, %s29_s27, [#allocation6], %s260_s22, %s260_s22, %s261_s23  }
  0x23   :  { %253 = dma.done.wait [#allocation3], 256  }
  0x24   :  { %254 = vsyncadd [#allocation3], 4294967040 }
  0x25   :  { %255 = dma.done.wait [#allocation6], 512  }
  0x26   :  { %256 = vsyncadd [#allocation6], 4294966784  ;;  %v263_v0 = vmov 0.0|0.0   ;;  %vm264_vm0 = vmmov 0   ;;  %v265_v1 = vmov 0.0   ;;  %v45_v2 = vld [vmem:[#allocation5] sm:$0xff] }
  0x27   :  { %171 = vmatprep.subr.bf16.mxu0 %v263_v0  ;;  %168 = vmatprep.mubr.msk.f32.mxu0 %vm264_vm0, %v265_v1  ;;  %v46_v3 = vld [vmem:[#allocation5 + $0x8] sm:$0xff]  ;;  %v47_v4 = vld [vmem:[#allocation5 + $0x10] sm:$0xff]  ;;  %v48_v6 = vld [vmem:[#allocation5 + $0x18] sm:$0xff]  ;;  %vm59_vm1 = vcmask 1041409   ;;  %vm61_vm2 = vcmask 261120   ;;  %s266_s11 = smov [#allocation7]  }
  0x28   :  { %v172_v5 = vpack.c.bf16 %v46_v3, %v45_v2  ;;  %v44_v7 = vld [vmem:[#allocation2 + $0x8] sm:$0xff]  ;;  %v175_v8 = vpack.c.bf16 %v48_v6, %v47_v4  ;;  %v43_v10 = vld [vmem:[#allocation2] sm:$0xff]  ;;  %s143_s12 = sshll.u32 %s266_s11, 4  ;;  %vm135_vm3 = vcmask 254976   ;;  %s144_s12 = int_to_ptr.vmem [resolvable:$true] %s143_s12 }
  0x29   :  { %v58_v9 = vrot.slane %v44_v7, 7  ;;  %v153_v12 = vld [vmem:[%s328_s2] ss:$0 sm:$0xff]  ;;  %s231_s13 = scalar_lea.vmem %s144_s12, 32  ;;  %p236_p3 = scmp.lt.s32.totalorder %s144_s12, %s144_s12 }
  0x2a   :  { %173 = vmatpush3.bf16.msra.mxu0 %v172_v5  ;;  %p232_p2 = scmp.ne.s32.totalorder %s144_s12, %s231_s13  ;;  %p237_p4 = scmp.lt.s32.totalorder %s231_s13, %s231_s13 }
  0x2b   :  { %174 = vmatprep.subr.bf16.mxu0 %v263_v0  ;;  %v60_v11 = vsel %vm59_vm1, %v58_v9, %v43_v10 }
  0x2c   :  { %p238_p5 = por %p237_p4, %p236_p3 }
  0x2e   :  { %176 = vmatpush3.bf16.msra.mxu0 %v175_v8  ;;  %p239_p6 = pnand %p238_p5, %p232_p2 }
  0x31   :  { %169 = vmatmul.mubr.msk.f32.vlgmr.msra.gmra.mrb[0].mxu0 %vm61_vm2, %v60_v11 }
 0x104   :  { %v130_v13 = vpop.f32.mrb[0].mxu0 }
 0x105   :  { %v131_v14 = vadd.f32 %v153_v12, %v130_v13  ;;  %v170_v15 = vpop.f32.mrb[1].mxu0 }
 0x107   :  { %185 = vtanh.f32 %v131_v14 }
 0x111   :  { %v186_v16 = vpop.eup %185 }
 0x112   :  { %136 = vst.msk [vmem:[#allocation7] sm:$0x3] %vm135_vm3, %v186_v16 }
 0x113   :  { %242 = shalt.err (!%p239_p6)
}
 0x114   :  { %s243_s2 = scalar_lea.hbm %s329_s3, 32 }
 0x115   :  { %p244_p7 = scmp.ne.s32.totalorder %s329_s3, %s243_s2  ;;  %p247_p8 = scmp.lt.u32.totalorder %s243_s2, %s329_s3 }
 0x117   :  { %p249_p9 = pnand %p247_p8, %p244_p7 }
 0x119   :  { %252 = shalt.err (!%p249_p9)
}
 0x11a   :  { %146 = dma.vmem_to_hbm [thread:$0]  %s144_s12, 32, %s329_s3, [#allocation4]  }
 0x11b   :  { %257 = dma.done.wait [#allocation4], 32  }
 0x11c   :  { %258 = vsyncadd [#allocation4], 4294967264 }
 0x11d   :  { %150 = vsyncpa [#allocation3], 1 }
 0x11e   :  { %151 = vsyncpa [#allocation6], 1 }
 0x11f   :  { %152 = vsyncpa [#allocation4], 1 }

</bundles_post_ra>
